<compile_context>
chip_gen: v5e
topology: v5e:2x2
jax: 0.10.0
libtpu: 0.0.40
codegen_flags: <defaults>
</compile_context>

<pallas_src>
import jax
import jax.numpy as jnp
from jax import lax
from jax.experimental import pallas as pl
from jax.experimental.pallas import tpu as pltpu

EPS = 1e-5  # spec: BertLayerNorm(hidden_size, eps=1e-05)


def _self_output_kernel(hs_ref, inp_ref, wt_ref, b_ref, g_ref, beta_ref, out_ref):
    # hs_ref/inp_ref/out_ref: (tm, H); wt_ref: (H, H) pre-transposed to (in, out) so the
    # MXU consumes it directly (no per-step XLU transpose). Matmul in native dtype,
    # f32 accumulation.
    y = jnp.dot(hs_ref[...], wt_ref[...], preferred_element_type=jnp.float32)
    # F.linear bias + residual add; epilogue math in f32.
    x = y + b_ref[...].astype(jnp.float32) + inp_ref[...].astype(jnp.float32)
    # TODO(synk): dropout is identity in eval mode; training-mode RNG mask omitted.
    # Fused-moment LayerNorm over the hidden (last) axis: one pass yields E[x], E[x^2].
    inv_h = 1.0 / x.shape[-1]
    s1 = jnp.sum(x, axis=-1, keepdims=True)
    s2 = jnp.sum(x * x, axis=-1, keepdims=True)
    mu = s1 * inv_h
    var = jnp.maximum(s2 * inv_h - mu * mu, 0.0)  # clamp guards cancellation
    xn = (x - mu) * lax.rsqrt(var + EPS)
    out = xn * g_ref[...].astype(jnp.float32) + beta_ref[...].astype(jnp.float32)
    out_ref[...] = out.astype(out_ref.dtype)


def _resident_spec(shape):
    """BlockSpec for a grid-invariant operand (constant block index, single-buffered)."""
    index_map = lambda i: (0, 0)
    try:
        return pl.BlockSpec(shape, index_map,
                            pipeline_mode=pl.Buffered(buffer_count=1))
    except (AttributeError, TypeError):
        # Older jax without pipeline_mode / Buffered: fall back to default buffering.
        return pl.BlockSpec(shape, index_map)


def _pick_tile_and_vmem(M, H, dtype):
    """Row-tile and VMEM-limit selection (runs at trace time on static shapes)."""
    sub = 16 if dtype == jnp.bfloat16 else 8       # sublane packing of the dtype
    itemsize = jnp.dtype(dtype).itemsize

    tm = 512
    # Ensure >= 2 grid steps when M allows it, so both v7x TensorCores get a row slab.
    while tm > sub and pl.cdiv(M, tm) < 2:
        tm //= 2
    tm = max(tm, sub)

    def vmem_need(t):
        stream = 2 * 2 * t * H * itemsize          # hs + residual, double-buffered
        outb = 2 * t * H * itemsize                # output, double-buffered
        wgt = H * H * itemsize                     # W^T, single-buffered
        small = 4 * 2 * H * 4                      # bias/gamma/beta + slack
        epi = 6 * t * H * 4                        # f32 acc + LayerNorm temporaries
        return stream + outb + wgt + small + epi

    budget = 48 * 1024 * 1024                      # keeps the pipelined regime on v7x
    while tm > sub and vmem_need(tm) > budget:
        tm //= 2
    # TODO(synk): for very large H (>= 2048 f32) the resident W^T alone approaches the
    # v7x 64 MiB/TC VMEM; a K-tiled matmul (extra grid axis + f32 acc scratch) would be
    # needed there.

    vmem_limit = int(1.25 * vmem_need(tm))
    vmem_limit = min(max(vmem_limit, 32 * 1024 * 1024), 64 * 1024 * 1024)
    return tm, vmem_limit


@jax.jit
def bert_self_output(hidden_states, input_tensor, weight_t, bias, gamma, beta):
    """BertSelfOutput forward.

    Args:
      hidden_states, input_tensor: (B, S, H)
      weight_t: (H, H) = dense.weight.T, i.e. (in, out) layout, pre-transposed ONCE at
                model init (hoisted out of the per-call path).
      bias, gamma, beta: (H,)
    """
    B, S, H = hidden_states.shape
    M = B * S
    tm, vmem_limit = _pick_tile_and_vmem(M, H, hidden_states.dtype)

    hs2 = hidden_states.reshape(M, H)
    in2 = input_tensor.reshape(M, H)
    b2 = bias.reshape(1, H)
    g2 = gamma.reshape(1, H)
    beta2 = beta.reshape(1, H)

    out = pl.pallas_call(
        _self_output_kernel,
        out_shape=jax.ShapeDtypeStruct((M, H), hidden_states.dtype),
        grid_spec=pltpu.PrefetchScalarGridSpec(
            num_scalar_prefetch=0,
            grid=(pl.cdiv(M, tm),),                # boundary tile masked by Pallas
            in_specs=[
                pl.BlockSpec((tm, H), lambda i: (i, 0)),   # hidden_states tile
                pl.BlockSpec((tm, H), lambda i: (i, 0)),   # residual tile
                _resident_spec((H, H)),                    # W^T, single-buffered
                _resident_spec((1, H)),                    # dense.bias
                _resident_spec((1, H)),                    # LayerNorm gamma
                _resident_spec((1, H)),                    # LayerNorm beta
            ],
            out_specs=pl.BlockSpec((tm, H), lambda i: (i, 0)),
        ),
        compiler_params=pltpu.CompilerParams(
            dimension_semantics=("parallel",),
            vmem_limit_bytes=vmem_limit,
        ),
    )(hs2, in2, weight_t, b2, g2, beta2)
    return out.reshape(B, S, H)


def _reference(hidden_states, input_tensor, weight, bias, gamma, beta):
    y = jnp.einsum("bsh,oh->bso", hidden_states, weight) + bias
    x = y + input_tensor
    mu = jnp.mean(x, axis=-1, keepdims=True)
    var = jnp.mean((x - mu) ** 2, axis=-1, keepdims=True)
    return (x - mu) / jnp.sqrt(var + EPS) * gamma + beta


if __name__ == "__main__":
    batch, seq, hidden = 2, 8, 32
    key = jax.random.PRNGKey(0)
    k1, k2, k3, k4, k5, k6 = jax.random.split(key, 6)

    hidden_states = jax.random.normal(k1, (batch, seq, hidden), jnp.float32)
    input_tensor = jax.random.normal(k2, (batch, seq, hidden), jnp.float32)
    # nn.Linear(hidden, hidden): weight (out, in), bias (out,)
    weight = jax.random.normal(k3, (hidden, hidden), jnp.float32) * 0.02
    bias = jax.random.normal(k4, (hidden,), jnp.float32) * 0.02
    # BertLayerNorm affine params
    gamma = 1.0 + 0.1 * jax.random.normal(k5, (hidden,), jnp.float32)
    beta = 0.1 * jax.random.normal(k6, (hidden,), jnp.float32)

    # Pre-transpose once at "model init" (hoisted out of the per-call jitted path).
    weight_t = jnp.asarray(weight.T)

    out = bert_self_output(hidden_states, input_tensor, weight_t, bias, gamma, beta)
    out = jax.block_until_ready(out)

    ref = _reference(hidden_states, input_tensor, weight, bias, gamma, beta)
    assert out.shape == (batch, seq, hidden)
    assert jnp.allclose(out, ref, atol=1e-4, rtol=1e-4), "mismatch vs reference"
    print("KERNEL_OK")
</pallas_src>

<mosaic_0001>
module attributes {stable_mosaic.version = 11 : i64} {
  func.func @_self_output_kernel(%arg0: i32, %arg1: memref<8x32xf32, #tpu.memory_space<vmem>>, %arg2: memref<8x32xf32, #tpu.memory_space<vmem>>, %arg3: memref<32x32xf32, #tpu.memory_space<vmem>>, %arg4: memref<1x32xf32, #tpu.memory_space<vmem>>, %arg5: memref<1x32xf32, #tpu.memory_space<vmem>>, %arg6: memref<1x32xf32, #tpu.memory_space<vmem>>, %arg7: memref<8x32xf32, #tpu.memory_space<vmem>>) attributes {dimension_semantics = [#tpu.dimension_semantics<parallel>], iteration_bounds = array<i64: 2>, scalar_prefetch = 0 : i64, scratch_operands = 0 : i64, tpu.core_type = #tpu.core_type<tc>, window_params = [{transform_indices = @transform_0, window_bounds = array<i64: 8, 32>}, {transform_indices = @transform_1, window_bounds = array<i64: 8, 32>}, {pipeline_mode = #tpu.pipeline_mode<synchronous>, transform_indices = @transform_2, window_bounds = array<i64: 32, 32>}, {pipeline_mode = #tpu.pipeline_mode<synchronous>, transform_indices = @transform_3, window_bounds = array<i64: 1, 32>}, {pipeline_mode = #tpu.pipeline_mode<synchronous>, transform_indices = @transform_4, window_bounds = array<i64: 1, 32>}, {pipeline_mode = #tpu.pipeline_mode<synchronous>, transform_indices = @transform_5, window_bounds = array<i64: 1, 32>}, {transform_indices = @transform_6, window_bounds = array<i64: 8, 32>}]} {
    %c0 = arith.constant 0 : index
    %c0_0 = arith.constant 0 : index
    %0 = vector.load %arg1[%c0, %c0_0] : memref<8x32xf32, #tpu.memory_space<vmem>>, vector<8x32xf32>
    %c0_1 = arith.constant 0 : index
    %c0_2 = arith.constant 0 : index
    %1 = vector.load %arg3[%c0_1, %c0_2] : memref<32x32xf32, #tpu.memory_space<vmem>>, vector<32x32xf32>
    %cst = arith.constant dense<0.000000e+00> : vector<8x32xf32>
    %2 = tpu.matmul %0, %1, %cst {dimension_numbers = #tpu.dot_dimension_numbers<[1], [0], [0], [1], [0, 0, 1, 1], [], []>} : vector<8x32xf32>, vector<32x32xf32>, vector<8x32xf32> -> vector<8x32xf32>
    %c0_3 = arith.constant 0 : index
    %c0_4 = arith.constant 0 : index
    %3 = vector.load %arg4[%c0_3, %c0_4] : memref<1x32xf32, #tpu.memory_space<vmem>>, vector<1x32xf32>
    %4 = vector.broadcast %3 : vector<1x32xf32> to vector<8x32xf32>
    %5 = arith.addf %2, %4 : vector<8x32xf32>
    %c0_5 = arith.constant 0 : index
    %c0_6 = arith.constant 0 : index
    %6 = vector.load %arg2[%c0_5, %c0_6] : memref<8x32xf32, #tpu.memory_space<vmem>>, vector<8x32xf32>
    %7 = arith.addf %5, %6 : vector<8x32xf32>
    %cst_7 = arith.constant dense<0.000000e+00> : vector<8xf32>
    %8 = vector.multi_reduction <add>, %7, %cst_7 [1] : vector<8x32xf32> to vector<8xf32>
    %9 = vector.shape_cast %8 : vector<8xf32> to vector<8x1xf32>
    %10 = arith.mulf %7, %7 : vector<8x32xf32>
    %cst_8 = arith.constant dense<0.000000e+00> : vector<8xf32>
    %11 = vector.multi_reduction <add>, %10, %cst_8 [1] : vector<8x32xf32> to vector<8xf32>
    %12 = vector.shape_cast %11 : vector<8xf32> to vector<8x1xf32>
    %cst_9 = arith.constant 3.125000e-02 : f32
    %13 = vector.broadcast %cst_9 : f32 to vector<8x1xf32>
    %14 = arith.mulf %9, %13 : vector<8x1xf32>
    %cst_10 = arith.constant 3.125000e-02 : f32
    %15 = vector.broadcast %cst_10 : f32 to vector<8x1xf32>
    %16 = arith.mulf %12, %15 : vector<8x1xf32>
    %17 = arith.mulf %14, %14 : vector<8x1xf32>
    %18 = arith.subf %16, %17 : vector<8x1xf32>
    %cst_11 = arith.constant 0.000000e+00 : f32
    %19 = vector.broadcast %cst_11 : f32 to vector<8x1xf32>
    %20 = arith.maximumf %18, %19 : vector<8x1xf32>
    %21 = vector.broadcast %14 : vector<8x1xf32> to vector<8x32xf32>
    %22 = arith.subf %7, %21 : vector<8x32xf32>
    %cst_12 = arith.constant 9.99999974E-6 : f32
    %23 = vector.broadcast %cst_12 : f32 to vector<8x1xf32>
    %24 = arith.addf %20, %23 : vector<8x1xf32>
    %25 = math.rsqrt %24 : vector<8x1xf32>
    %26 = vector.broadcast %25 : vector<8x1xf32> to vector<8x32xf32>
    %27 = arith.mulf %22, %26 : vector<8x32xf32>
    %c0_13 = arith.constant 0 : index
    %c0_14 = arith.constant 0 : index
    %28 = vector.load %arg5[%c0_13, %c0_14] : memref<1x32xf32, #tpu.memory_space<vmem>>, vector<1x32xf32>
    %29 = vector.broadcast %28 : vector<1x32xf32> to vector<8x32xf32>
    %30 = arith.mulf %27, %29 : vector<8x32xf32>
    %c0_15 = arith.constant 0 : index
    %c0_16 = arith.constant 0 : index
    %31 = vector.load %arg6[%c0_15, %c0_16] : memref<1x32xf32, #tpu.memory_space<vmem>>, vector<1x32xf32>
    %32 = vector.broadcast %31 : vector<1x32xf32> to vector<8x32xf32>
    %33 = arith.addf %30, %32 : vector<8x32xf32>
    %c0_17 = arith.constant 0 : index
    %c0_18 = arith.constant 0 : index
    %34 = vector.load %arg7[%c0_17, %c0_18] : memref<8x32xf32, #tpu.memory_space<vmem>>, vector<8x32xf32>
    tpu.vector_store %arg7[%c0_17, %c0_18], %33 {strides = array<i32>} : memref<8x32xf32, #tpu.memory_space<vmem>>, vector<8x32xf32>,
    return
  }
  func.func @transform_0(%arg0: i32) -> (i32, i32) {
    %c0_i32 = arith.constant 0 : i32
    %c0_i32_0 = arith.constant 0 : i32
    return %arg0, %c0_i32 : i32, i32
  }
  func.func @transform_1(%arg0: i32) -> (i32, i32) {
    %c0_i32 = arith.constant 0 : i32
    %c0_i32_0 = arith.constant 0 : i32
    return %arg0, %c0_i32 : i32, i32
  }
  func.func @transform_2(%arg0: i32) -> (i32, i32) {
    %c0_i32 = arith.constant 0 : i32
    %c0_i32_0 = arith.constant 0 : i32
    %c0_i32_1 = arith.constant 0 : i32
    return %c0_i32, %c0_i32_0 : i32, i32
  }
  func.func @transform_3(%arg0: i32) -> (i32, i32) {
    %c0_i32 = arith.constant 0 : i32
    %c0_i32_0 = arith.constant 0 : i32
    %c0_i32_1 = arith.constant 0 : i32
    return %c0_i32, %c0_i32_0 : i32, i32
  }
  func.func @transform_4(%arg0: i32) -> (i32, i32) {
    %c0_i32 = arith.constant 0 : i32
    %c0_i32_0 = arith.constant 0 : i32
    %c0_i32_1 = arith.constant 0 : i32
    return %c0_i32, %c0_i32_0 : i32, i32
  }
  func.func @transform_5(%arg0: i32) -> (i32, i32) {
    %c0_i32 = arith.constant 0 : i32
    %c0_i32_0 = arith.constant 0 : i32
    %c0_i32_1 = arith.constant 0 : i32
    return %c0_i32, %c0_i32_0 : i32, i32
  }
  func.func @transform_6(%arg0: i32) -> (i32, i32) {
    %c0_i32 = arith.constant 0 : i32
    %c0_i32_0 = arith.constant 0 : i32
    return %arg0, %c0_i32 : i32, i32
  }
}

</mosaic_0001>

<bundles_post_ra>
// kernel: bert_self_output.1
= control target key start
LH: loop header
LB: loop body
LE: loop exit
PB: predicated region body
PF: predicated region fallthrough
CT: control target
= control target key end

     0   :  { %s987_s0 = inlined_call_operand.hbm [shape: f32[16,32], index: 0, kind: input, shape index: {}]   ;;  %s988_s1 = inlined_call_operand.hbm [shape: f32[16,32], index: 1, kind: input, shape index: {}]   ;;  %s989_s2 = inlined_call_operand.hbm [shape: f32[32,32], index: 2, kind: input, shape index: {}]   ;;  %s990_s3 = inlined_call_operand.vmem [shape: f32[1,32], index: 3, kind: input, shape index: {}]   ;;  %s991_s4 = inlined_call_operand.vmem [shape: f32[1,32], index: 4, kind: input, shape index: {}]   ;;  %s992_s5 = inlined_call_operand.vmem [shape: f32[1,32], index: 5, kind: input, shape index: {}]   ;;  %s993_s6 = inlined_call_operand.hbm [shape: f32[16,32], index: 6, kind: output, shape index: {}]  }
   0x1   :  { %998 = sst [smem:[#allocation17_spill]] %s989_s2 }
   0x2   :  { %11 = vsyncpa [#allocation3], 0 }
   0x3   :  { %13 = vsyncpa [#allocation3 + $0x1], 0 }
   0x4   :  { %14 = vsyncpa [#allocation6], 0 }
   0x5   :  { %16 = vsyncpa [#allocation6 + $0x1], 0 }
   0x6   :  { %17 = vsyncpa [#allocation4], 0 }
   0x7   :  { %19 = vsyncpa [#allocation4 + $0x1], 0  ;;  %s804_s21 = smov 0   ;;  %s806_s22 = smov 0  }
   0x8   :  { %s808_s23 = smov 0   ;;  %s810_s24 = smov 0  }
   0x9 LB: > { %999 = sst [smem:[#allocation13_spill]] %s760_s23  ;;  %s828_s28 = sadd.s32 4294967295, %s764_s24   ;;  %s764_s24 = sphi %s810_s24, %s1012_s24   ;;  %s760_s23 = sphi %s808_s23, %s1014_s23   ;;  %s756_s22 = sphi %s806_s22, %s1016_s22   ;;  %s752_s21 = sphi %s804_s21, %s1015_s21  }
   0xa   : > { %1000 = sst [smem:[#allocation14_spill]] %s764_s24  ;;  %p514_p0 = scmp.ge.s32.totalorder %s764_s24, 1 }
   0xb   : > { %s1001_s2 = sld [smem:[#allocation17_spill]]  ;;  %p46_p1 = scmp.eq.s32.totalorder %s828_s28, 0 }
   0xc   : > { %p192_p2 = scmp.lt.s32.totalorder %s764_s24, 3  ;;  %s766_s30 = smov [#allocation7]  }
   0xd   : > { %s205_s7 = sshll.u32 %s766_s30, 4  ;;  %s767_s8 = smov 128   ;;  %s206_s7 = int_to_ptr.vmem [resolvable:$true] %s205_s7 }
   0xe   : > { %p833_p3 = pnand %p514_p0, %p192_p2  ;;  %s768_s9 = smov 8  }
   0xf   : > { %s513_s10 = sadd.s32 4294967294, %s764_s24   ;;  %s844_s11 = sadd.s32 1, %s764_s24  }
  0x10   : > { %p541_p4 = pneg %p833_p3  ;;  %1003 = sst [smem:[#allocation15_spill]] %s844_s11 }
  0x11   : > { %s203_s27 = sshll.u32 %s1001_s2, 4  ;;  %s32_s12 = sadd.s32 1, %s760_s23  ;;  %s204_s27 = int_to_ptr.hbm [resolvable:$true] %s203_s27 }
  0x12   : > { %p542_p6 = pnand %p541_p4, %p46_p1  ;;  %s29_s13 = ssub.s32 %s764_s24, %s844_s11 }
  0x13   : > { %p39_p7 = scmp.ne.s32.totalorder %s760_s23, %s756_s22  ;;  %p30_p8 = scmp.eq.s32.totalorder %s29_s13, 0 }
  0x14   : > { %544 = dma.hbm_to_vmem [thread:$0]  (!%p542_p6), %s204_s27, 512, %s206_s7, [#allocation6], %s767_s8, %s767_s8, %s768_s9  }
  0x15   : > { %p40_p9 = scmp.eq.s32.totalorder %s764_s24, 0  ;;  %p45_p10 = scmp.ne.s32.totalorder %s756_s22, %s752_s21 }
  0x16   : > { %p179_p11 = scmp.eq.s32.totalorder %s828_s28, 1  ;;  %p185_p2 = scmp.eq.s32.totalorder %s513_s10, 1 }
  0x17   : > { %s856_s14 = scalar_select %p30_p8, %s760_s23, %s32_s12  }
  0x18   : > { %p858_p12 = por %p40_p9, %p39_p7  ;;  %p864_p13 = por %p46_p1, %p45_p10 }
  0x19   : > { %1004 = sst [smem:[#allocation16_spill]] %s856_s14  ;;  %p868_p0 = por %p179_p11, %p39_p7 }
  0x1a   : > { %p557_p4 = scmp.lt.s32.totalorder %s764_s24, 2  ;;  %s228_s18 = sand.u32 1, %s760_s23  }
  0x1b   : > { %p874_p6 = por %p185_p2, %p45_p10  ;;  %s517_s20 = sshll.u32 %s228_s18, 3 }
  0x1c   : > { %s518_s25 = sshll.u32 %s764_s24, 3  ;;  %s232_s8 = scalar_lea.vmem [#allocation2], %s517_s20 }
  0x1d   : > { %s236_s30 = scalar_lea.hbm %s987_s0, %s518_s25  ;;  %s240_s9 = sshll.u32 %s232_s8, 4  ;;  %s241_s9 = int_to_ptr.vmem [resolvable:$true] %s240_s9 }
  0x1e   : > { %s238_s7 = sshll.u32 %s236_s30, 4  ;;  %p884_p7 = pnand %p557_p4, %p858_p12  ;;  %s239_s7 = int_to_ptr.hbm [resolvable:$true] %s238_s7 }
  0x1f   : > { %s255_s2 = scalar_lea.hbm %s988_s1, %s518_s25  ;;  %s247_s14 = sand.u32 1, %s764_s24  }
  0x20   : > { %s229_s23 = scalar_lea.sflag [#allocation3], %s228_s18  ;;  %s630_s26 = sshra.s32 %s239_s7, 4  ;;  %s631_s26 = int_to_ptr.hbm [resolvable:$true] %s630_s26 }
  0x21   : > { %s632_s27 = scalar_lea.hbm %s631_s26, 8  ;;  %p634_p9 = pneg %p884_p7 }
  0x22   : > { %p633_p8 = scmp.ne.s32.totalorder %s631_s26, %s632_s27  ;;  %s637_s8 = scalar_lea.hbm %s987_s0, 16 }
  0x23   : > { %p638_p12 = scmp.lt.s32.totalorder %s631_s26, %s987_s0  ;;  %p639_p2 = scmp.lt.s32.totalorder %s637_s8, %s632_s27 }
  0x24   : > { %p635_p10 = pnand %p634_p9, %p633_p8 }
  0x25   : > { %p640_p4 = por %p639_p2, %p638_p12 }
  0x26   : > { %p636_p11 = pneg %p635_p10 }
  0x28   : > { %p641_p5 = pnand %p640_p4, %p636_p11 }
  0x2a   : > { %644 = shalt.err (!%p641_p5)
}
  0x2b   : > { %548 = dma.hbm_to_vmem [thread:$0]  (!%p884_p7), %s239_s7, 128, %s241_s9, %s229_s23  }
  0x2c   : > { %s257_s18 = sshll.u32 %s255_s2, 4  ;;  %s251_s25 = scalar_lea.vmem [#allocation5], %s517_s20  ;;  %s258_s18 = int_to_ptr.hbm [resolvable:$true] %s257_s18 }
  0x2d   : > { %s259_s11 = sshll.u32 %s251_s25, 4  ;;  %s248_s24 = scalar_lea.sflag [#allocation6], %s247_s14  ;;  %s260_s11 = int_to_ptr.vmem [resolvable:$true] %s259_s11 }
  0x2e   : > { %s660_s15 = sshra.s32 %s258_s18, 4  ;;  %s667_s8 = scalar_lea.hbm %s988_s1, 16  ;;  %s661_s15 = int_to_ptr.hbm [resolvable:$true] %s660_s15 }
  0x2f   : > { %s662_s30 = scalar_lea.hbm %s661_s15, 8  ;;  %p668_p5 = scmp.lt.s32.totalorder %s661_s15, %s988_s1 }
  0x30   : > { %p663_p8 = scmp.ne.s32.totalorder %s661_s15, %s662_s30  ;;  %p669_p11 = scmp.lt.s32.totalorder %s667_s8, %s662_s30 }
  0x32   : > { %p665_p10 = pnand %p663_p8, %p634_p9  ;;  %p670_p2 = por %p669_p11, %p668_p5 }
  0x34   : > { %p666_p12 = pneg %p665_p10 }
  0x36   : > { %p671_p4 = pnand %p670_p2, %p666_p12 }
  0x38   : > { %674 = shalt.err (!%p671_p4)
}
  0x39   : > { %551 = dma.hbm_to_vmem [thread:$0]  (!%p884_p7), %s258_s18, 128, %s260_s11, %s248_s24  }
  0x3a   : > { %268 = sbr.rel (%p833_p3) target bundleno = 367 (0x16f), region = 44  ;;  %s919_s2 = sand.u32 (!%p833_p3), 1, %s756_s22  }
  0x3b   : > { %s922_s14 = sshll.u32 (!%p833_p3), %s919_s2, 3  ;;  %s271_s20 = scalar_lea.sflag (!%p833_p3), [#allocation3], %s919_s2 }
  0x3c   : > { %s274_s7 = scalar_lea.vmem (!%p833_p3), [#allocation2], %s922_s14 }
  0x3f   : > { %735 = dma.done.wait (%p864_p13), %s271_s20, 128  }
  0x40   : > { %737 = vsyncadd (%p864_p13), %s271_s20, 4294967168  ;;  %s280_s24 = sand.u32 1, %s828_s28   ;;  %s284_s11 = scalar_lea.vmem [#allocation5], %s922_s14 }
  0x41   : > { %s281_s29 = scalar_lea.sflag [#allocation6], %s280_s24 }
  0x42   : > { %739 = dma.done.wait (%p864_p13), %s281_s29, 128  }
  0x43   : > { %741 = vsyncadd (%p864_p13), %s281_s29, 4294967168 }
  0x44   : > { %743 = dma.done.wait (%p46_p1), [#allocation6], 512  }
  0x45   : > { %745 = vsyncadd (%p46_p1), [#allocation6], 4294966784  ;;  %v328_v0 = vld [vmem:[#allocation7 + $0x18] sm:$0xff]  ;;  %v327_v1 = vld [vmem:[#allocation7 + $0x10] sm:$0xff]  ;;  %vm333_vm0 = vcmask 261120   ;;  %s528_s10 = sshll.u32 %s828_s28, 3 }
  0x46   : > { %349 = vmatpush.msra.mxu0 %v328_v0  ;;  %v326_v2 = vld [vmem:[#allocation7 + $0x8] sm:$0xff]  ;;  %v325_v3 = vld [vmem:[#allocation7] sm:$0xff]  ;;  %v357_v7 = vld [vmem:[%s284_s11] sm:$0xff]  ;;  %s406_s30 = scalar_lea.hbm %s993_s6, %s528_s10  ;;  %s323_s28 = scalar_lea.vmem [#allocation8], %s922_s14 }
  0x47   : > { %v324_v4 = vld [vmem:[%s274_s7] sm:$0xff]  ;;  %s408_s8 = sshll.u32 %s323_s28, 4  ;;  %s410_s12 = sshll.u32 %s406_s30, 4  ;;  %s409_s8 = int_to_ptr.vmem [resolvable:$true] %s408_s8  ;;  %s411_s12 = int_to_ptr.hbm [resolvable:$true] %s410_s12 }
  0x48   : > { %350 = vmatpush.msra.mxu0 %v327_v1  ;;  %v595_v5 = vld [vmem:[%s990_s3] ss:$0 sm:$0xff]  ;;  %s396_s23 = scalar_lea.sflag [#allocation4], %s919_s2  ;;  %s704_s20 = sshra.s32 %s411_s12, 4  ;;  %s705_s20 = int_to_ptr.hbm [resolvable:$true] %s704_s20 }
  0x49   : > { %v596_v28 = vld [vmem:[%s991_s4] ss:$0 sm:$0xff]  ;;  %s706_s7 = scalar_lea.hbm %s705_s20, 8  ;;  %s710_s14 = scalar_lea.hbm %s993_s6, 16 }
  0x4a   : > { %351 = vmatpush.msra.mxu0 %v326_v2  ;;  %v597_v31 = vld [vmem:[%s992_s5] ss:$0 sm:$0xff]  ;;  %p707_p1 = scmp.ne.s32.totalorder %s705_s20, %s706_s7  ;;  %p711_p7 = scmp.lt.s32.totalorder %s705_s20, %s993_s6 }
  0x4b   : > { %p712_p9 = scmp.lt.s32.totalorder %s710_s14, %s706_s7 }
  0x4c   : > { %352 = vmatpush.msra.mxu0 %v325_v3  ;;  %p708_p3 = pnand %p707_p1, %p868_p0 }
  0x4d   : > { %526 = vmatmul.msk.f32.vlgmr.msra.gmra.mxu0 %vm333_vm0, %v324_v4  ;;  %p713_p8 = por %p712_p9, %p711_p7 }
  0x4e   : > { %p709_p13 = pneg %p708_p3 }
  0x50   : > { %p714_p10 = pnand %p713_p8, %p709_p13 }
  0xca   : > { %v354_v6 = vpop.f32.mrf.mxu0 }
  0xcb   : > { %v355_v8 = vadd.f32 %v595_v5, %v354_v6 }
  0xcd   : > { %v358_v9 = vadd.f32 %v357_v7, %v355_v8 }
  0xcf   : > { %v359_v10 = vsel %vm333_vm0, %v358_v9, 0.0  ;;  %v362_v11 = vmul.f32 %v358_v9, %v358_v9 }
  0xd0   : > { %360 = vadd.xlane.f32.xlu0 %v359_v10 }
  0xd1   : > { %v363_v12 = vsel %vm333_vm0, %v362_v11, 0.0 }
  0xd8   : > { %364 = vadd.xlane.f32.xlu0 %v363_v12 }
 0x143   : > { %v361_v13 = vpop.xlane.xlu0 %360 }
 0x144   : > { %v366_v14 = vmul.f32 0.03125, %v361_v13 }
 0x146   : > { %v368_v16 = vmul.f32 %v366_v14, %v366_v14  ;;  %v371_v27 = vsub.f32 %v358_v9, %v366_v14 }
 0x14b   : > { %v365_v15 = vpop.xlane.xlu0 %364 }
 0x14c   : > { %v367_v17 = vmul.f32 0.03125, %v365_v15 }
 0x14e   : > { %v369_v18 = vsub.f32 %v367_v17, %v368_v16 }
 0x150   : > { %v370_v19 = vmax.f32 %v369_v18, 0.0 }
 0x152   : > { %v372_v20 = vadd.f32 1e-05, %v370_v19 }
 0x154   : > { %598 = vrsqrt.f32 %v372_v20  ;;  %vm379_vm2 = vweird.f32 %v372_v20 }
 0x15a   : > { %v599_v21 = vpop.eup %598 }
 0x15b   : > { %v374_v22 = vmul.f32 %v599_v21, %v372_v20  ;;  %vm380_vm1 = vweird.f32 %v599_v21 }
 0x15c   : > { %vm381_vm3 = vmor %vm379_vm2, %vm380_vm1 }
 0x15d   : > { %v375_v23 = vmul.f32 %v599_v21, %v374_v22 }
 0x15f   : > { %v376_v24 = vmul.f32 0.5, %v375_v23 }
 0x161   : > { %v377_v25 = vsub.f32 1.5, %v376_v24 }
 0x163   : > { %v378_v26 = vmul.f32 %v599_v21, %v377_v25 }
 0x165   : > { %v382_v29 = vsel %vm381_vm3, %v599_v21, %v378_v26 }
 0x166   : > { %v383_v30 = vmul.f32 %v382_v29, %v371_v27 }
 0x168   : > { %v388_v32 = vmul.f32 %v596_v28, %v383_v30 }
 0x16a   : > { %v393_v33 = vadd.f32 %v597_v31, %v388_v32 }
 0x16c   : > { %394 = vst.msk [vmem:[%s323_s28] sm:$0xff] %vm333_vm0, %v393_v33 }
 0x16d   : > { %717 = shalt.err (!%p714_p10)
}
 0x16e   : > { %539 = dma.vmem_to_hbm [thread:$0]  (%p868_p0), %s409_s8, 128, %s411_s12, %s396_s23  }
 0x16f PF: > { %s1010_s2 = sld [smem:[#allocation14_spill]]  ;;  %s422_s9 = sand.u32 1, %s752_s21  }
 0x170   : > { %s423_s10 = scalar_lea.sflag [#allocation4], %s422_s9 }
 0x175   : > { %p1011_p12 = scmp.ge.s32.totalorder %s1010_s2, 2 }
 0x177   : > { %p553_p5 = pnand %p1011_p12, %p874_p6 }
 0x179   : > { %p554_p11 = pneg %p553_p5 }
 0x17b   : > { %747 = dma.done.wait (%p554_p11), %s423_s10, 128  }
 0x17c   : > { %749 = vsyncadd (%p554_p11), %s423_s10, 4294967168  ;;  %s1012_s24 = sld [smem:[#allocation15_spill]]  ;;  %s1015_s21 = smov %s756_s22 }
 0x17d   : > { %s1013_s13 = sld [smem:[#allocation13_spill]] }
 0x17e   : > { %s1014_s23 = sld [smem:[#allocation16_spill]] }
 0x182   : > { %p22_p2 = scmp.ge.s32.totalorder %s1012_s24, 4  }
 0x183   : > { %s1016_s22 = smov %s1013_s13 }
 0x184   :  { %24 = sbr.rel (!%p22_p2) target bundleno = 9 (0x9), region = 106 }
 0x189   :  { %429 = vsyncpa [#allocation3], 1 }
 0x18a   :  { %431 = vsyncpa [#allocation3 + $0x1], 1 }
 0x18b   :  { %432 = vsyncpa [#allocation6], 1 }
 0x18c   :  { %434 = vsyncpa [#allocation6 + $0x1], 1 }
 0x18d   :  { %435 = vsyncpa [#allocation4], 1 }
 0x18e   :  { %437 = vsyncpa [#allocation4 + $0x1], 1 }

</bundles_post_ra>
